<compile_context>
chip_gen: v6e
topology: v6e:2x2x1
jax: 0.10.0
libtpu: 0.0.40
codegen_flags: <defaults>
</compile_context>

<pallas_src>
import functools

import jax
import jax.numpy as jnp
from jax.experimental import pallas as pl
from jax.experimental.pallas import tpu as pltpu


def fused_se_conv_kernel(x289_ref, w1t_ref, b1_ref, x_ref, w2_ref, o_ref):
    """One grid step computes output channels [j*tco, (j+1)*tco) of batch n.

    x289_ref: (N, Cg)      f32   gate input            (resident, DMA'd once)
    w1t_ref:  (Cg, Cm)     bf16  conv2d92 weight^T     (resident, DMA'd once)
    b1_ref:   (1, Cm)      f32   conv2d92 bias         (resident, DMA'd once)
    x_ref:    (1, Cm, HW)  bf16  main activation       (resident per n)
    w2_ref:   (tco, Cm)    bf16  conv2d93 weight tile  (streamed once per n)
    o_ref:    (1, tco, HW) f32   output tile, NCHW layout
    """
    n = pl.program_id(0)

    # --- gate branch: relu -> 1x1 conv (+bias) -> sigmoid (tiny; f32 epilogue) ---
    g = jnp.maximum(x289_ref[pl.ds(n, 1), :], 0.0)                    # (1, Cg) f32
    z = jnp.dot(g.astype(jnp.bfloat16), w1t_ref[...],
                preferred_element_type=jnp.float32)                   # (1, Cm) f32
    gate = jax.nn.sigmoid(z + b1_ref[...])                            # (1, Cm) f32

    # --- fold gate into the weight tile (row broadcast across tco sublanes) ---
    w2s = w2_ref[...] * gate.astype(jnp.bfloat16)                     # (tco, Cm) bf16

    # --- 1x1 conv as one MXU matmul; output lands directly in NCHW layout ---
    out = jnp.dot(w2s, x_ref[0], preferred_element_type=jnp.float32)  # (tco, HW) f32
    o_ref[0] = out.astype(o_ref.dtype)


def _round_up(x, m):
    return ((x + m - 1) // m) * m


@functools.partial(jax.jit, static_argnames=("tco",))
def module_forward(x289, x287, w1, b1, w2, *, tco=128):
    """Forward pass of module M.

    x289: [N, Cg, 1, 1] f32, x287: [N, Cm, H, W] f32 (NCHW, like PyTorch)
    w1:   [Cm, Cg] (conv2d92 1x1 weight, squeezed), b1: [Cm]
    w2:   [Co, Cm] (conv2d93 1x1 weight, squeezed, no bias), Co == Cm
    Returns NCHW [N, Co, H, W] f32.
    """
    N, Cg = x289.shape[0], x289.shape[1]
    _, Cm, H, W = x287.shape
    Co = w2.shape[0]
    HW = H * W

    # Only the output-channel axis needs padding so it tiles evenly by tco
    # (zero weight rows -> zero outputs, sliced off below).  Cg / Cm / HW are
    # used as full-extent block dims, so non-128-multiples (e.g. 726 / 2904 /
    # 196 at real scale) are fine without padding.
    Co_p = _round_up(Co, tco)
    num_j = Co_p // tco

    x289_2d = x289.reshape(N, Cg).astype(jnp.float32)
    w1t = jnp.transpose(w1).astype(jnp.bfloat16)              # (Cg, Cm)
    b1r = b1.reshape(1, Cm).astype(jnp.float32)
    x_flat = x287.reshape(N, Cm, HW).astype(jnp.bfloat16)     # free NCHW view
    w2_p = jnp.pad(w2.astype(jnp.bfloat16), ((0, Co_p - Co), (0, 0)))

    flops = 2 * N * num_j * Cg * Cm + 2 * N * Co_p * Cm * HW
    bytes_accessed = (x289_2d.size * 4 + w1t.size * 2 + b1r.size * 4
                      + x_flat.size * 2 + w2_p.size * 2 + N * Co_p * HW * 4)

    out_p = pl.pallas_call(
        fused_se_conv_kernel,
        out_shape=jax.ShapeDtypeStruct((N, Co_p, HW), jnp.float32),
        grid=(N, num_j),
        in_specs=[
            pl.BlockSpec((N, Cg), lambda n, j: (0, 0)),         # x289  (resident)
            pl.BlockSpec((Cg, Cm), lambda n, j: (0, 0)),        # w1^T  (resident)
            pl.BlockSpec((1, Cm), lambda n, j: (0, 0)),         # b1    (resident)
            pl.BlockSpec((1, Cm, HW), lambda n, j: (n, 0, 0)),  # x287  (resident per n)
            pl.BlockSpec((tco, Cm), lambda n, j: (j, 0)),       # w2 tile
        ],
        out_specs=pl.BlockSpec((1, tco, HW), lambda n, j: (n, j, 0)),
        compiler_params=pltpu.CompilerParams(
            dimension_semantics=("parallel", "parallel"),
            vmem_limit_bytes=48 * 1024 * 1024,
        ),
        cost_estimate=pl.CostEstimate(
            flops=flops,
            transcendentals=N * num_j * Cm,
            bytes_accessed=bytes_accessed,
        ),
    )(x289_2d, w1t, b1r, x_flat, w2_p)

    return out_p[:, :Co, :].reshape(N, Co, H, W)


if __name__ == "__main__":
    # Small shapes mirroring the module's structure: Cm = 3*Cg here (726 -> 2904
    # originally), channels that are multiples of 8 but NOT of 128 (like 2904),
    # small spatial extent.
    N, Cg, Cm, H, W = 2, 88, 264, 8, 8
    Co = Cm

    key = jax.random.PRNGKey(0)
    k1, k2, k3, k4, k5 = jax.random.split(key, 5)
    x289 = jax.random.normal(k1, (N, Cg, 1, 1), dtype=jnp.float32)
    x287 = jax.random.normal(k2, (N, Cm, H, W), dtype=jnp.float32)
    w1 = jax.random.normal(k3, (Cm, Cg), dtype=jnp.float32) * 0.05   # conv2d92 weight
    b1 = jax.random.normal(k4, (Cm,), dtype=jnp.float32) * 0.05      # conv2d92 bias
    w2 = jax.random.normal(k5, (Co, Cm), dtype=jnp.float32) * 0.05   # conv2d93 weight

    out = module_forward(x289, x287, w1, b1, w2, tco=128)
    out = jax.block_until_ready(out)

    # Pure-JAX f32 reference (kernel uses bf16 matmul operands -> loose tolerance).
    gate_ref = jax.nn.sigmoid(
        jnp.einsum("oc,nc->no", w1, jnp.maximum(x289[:, :, 0, 0], 0.0)) + b1
    )
    scaled_ref = x287 * gate_ref[:, :, None, None]
    ref = jnp.einsum("oc,nchw->nohw", w2, scaled_ref)

    assert out.shape == (N, Co, H, W)
    assert jnp.allclose(out, ref, atol=3e-2, rtol=3e-2), float(
        jnp.max(jnp.abs(out - ref))
    )

    print("KERNEL_OK")
</pallas_src>

<mosaic_0001>
module attributes {stable_mosaic.version = 11 : i64} {
  func.func @fused_se_conv_kernel(%arg0: i32, %arg1: i32, %arg2: memref<2x88xf32, #tpu.memory_space<vmem>>, %arg3: memref<88x264xbf16, #tpu.memory_space<vmem>>, %arg4: memref<1x264xf32, #tpu.memory_space<vmem>>, %arg5: memref<1x264x64xbf16, #tpu.memory_space<vmem>>, %arg6: memref<128x264xbf16, #tpu.memory_space<vmem>>, %arg7: memref<1x128x64xf32, #tpu.memory_space<vmem>>) attributes {dimension_semantics = [#tpu.dimension_semantics<parallel>, #tpu.dimension_semantics<parallel>], iteration_bounds = array<i64: 2, 3>, scalar_prefetch = 0 : i64, scratch_operands = 0 : i64, tpu.core_type = #tpu.core_type<tc>, window_params = [{pipeline_mode = #tpu.pipeline_mode<synchronous>, transform_indices = @transform_0, window_bounds = array<i64: 2, 88>}, {pipeline_mode = #tpu.pipeline_mode<synchronous>, transform_indices = @transform_1, window_bounds = array<i64: 88, 264>}, {pipeline_mode = #tpu.pipeline_mode<synchronous>, transform_indices = @transform_2, window_bounds = array<i64: 1, 264>}, {transform_indices = @transform_3, window_bounds = array<i64: 1, 264, 64>}, {transform_indices = @transform_4, window_bounds = array<i64: 128, 264>}, {transform_indices = @transform_5, window_bounds = array<i64: 1, 128, 64>}]} {
    %0 = arith.index_cast %arg0 : i32 to index
    %c0 = arith.constant 0 : index
    %1 = vector.load %arg2[%0, %c0] : memref<2x88xf32, #tpu.memory_space<vmem>>, vector<1x88xf32>
    %cst = arith.constant 0.000000e+00 : f32
    %2 = vector.broadcast %cst : f32 to vector<1x88xf32>
    %3 = arith.maximumf %1, %2 : vector<1x88xf32>
    %4 = arith.truncf %3 : vector<1x88xf32> to vector<1x88xbf16>
    %c0_0 = arith.constant 0 : index
    %c0_1 = arith.constant 0 : index
    %5 = vector.load %arg3[%c0_0, %c0_1] : memref<88x264xbf16, #tpu.memory_space<vmem>>, vector<88x264xbf16>
    %cst_2 = arith.constant dense<0.000000e+00> : vector<1x264xf32>
    %6 = tpu.matmul %4, %5, %cst_2 {dimension_numbers = #tpu.dot_dimension_numbers<[1], [0], [0], [1], [0, 0, 1, 1], [], []>} : vector<1x88xbf16>, vector<88x264xbf16>, vector<1x264xf32> -> vector<1x264xf32>
    %c0_3 = arith.constant 0 : index
    %c0_4 = arith.constant 0 : index
    %7 = vector.load %arg4[%c0_3, %c0_4] : memref<1x264xf32, #tpu.memory_space<vmem>>, vector<1x264xf32>
    %8 = arith.addf %6, %7 : vector<1x264xf32>
    %9 = arith.negf %8 : vector<1x264xf32>
    %10 = math.exp %9 : vector<1x264xf32>
    %cst_5 = arith.constant 1.000000e+00 : f32
    %11 = vector.broadcast %cst_5 : f32 to vector<1x264xf32>
    %12 = arith.addf %11, %10 : vector<1x264xf32>
    %13 = arith.divf %11, %12 : vector<1x264xf32>
    %c0_6 = arith.constant 0 : index
    %c0_7 = arith.constant 0 : index
    %14 = vector.load %arg6[%c0_6, %c0_7] : memref<128x264xbf16, #tpu.memory_space<vmem>>, vector<128x264xbf16>
    %15 = arith.truncf %13 : vector<1x264xf32> to vector<1x264xbf16>
    %16 = vector.broadcast %15 : vector<1x264xbf16> to vector<128x264xbf16>
    %17 = arith.mulf %14, %16 : vector<128x264xbf16>
    %c0_8 = arith.constant 0 : index
    %c0_9 = arith.constant 0 : index
    %c0_10 = arith.constant 0 : index
    %18 = vector.load %arg5[%c0_8, %c0_9, %c0_10] : memref<1x264x64xbf16, #tpu.memory_space<vmem>>, vector<1x264x64xbf16>
    %19 = vector.shape_cast %18 : vector<1x264x64xbf16> to vector<264x64xbf16>
    %cst_11 = arith.constant dense<0.000000e+00> : vector<128x64xf32>
    %20 = tpu.matmul %17, %19, %cst_11 {dimension_numbers = #tpu.dot_dimension_numbers<[1], [0], [0], [1], [0, 0, 1, 1], [], []>} : vector<128x264xbf16>, vector<264x64xbf16>, vector<128x64xf32> -> vector<128x64xf32>
    %c0_12 = arith.constant 0 : index
    %c0_13 = arith.constant 0 : index
    %c0_14 = arith.constant 0 : index
    %21 = vector.load %arg7[%c0_12, %c0_13, %c0_14] : memref<1x128x64xf32, #tpu.memory_space<vmem>>, vector<1x128x64xf32>
    %22 = vector.shape_cast %21 : vector<1x128x64xf32> to vector<128x64xf32>
    %23 = vector.shape_cast %20 : vector<128x64xf32> to vector<1x128x64xf32>
    tpu.vector_store %arg7[%c0_12, %c0_13, %c0_14], %23 {strides = array<i32>} : memref<1x128x64xf32, #tpu.memory_space<vmem>>, vector<1x128x64xf32>,
    return
  }
  func.func @transform_0(%arg0: i32, %arg1: i32) -> (i32, i32) {
    %c0_i32 = arith.constant 0 : i32
    %c0_i32_0 = arith.constant 0 : i32
    %c0_i32_1 = arith.constant 0 : i32
    return %c0_i32, %c0_i32_0 : i32, i32
  }
  func.func @transform_1(%arg0: i32, %arg1: i32) -> (i32, i32) {
    %c0_i32 = arith.constant 0 : i32
    %c0_i32_0 = arith.constant 0 : i32
    %c0_i32_1 = arith.constant 0 : i32
    return %c0_i32, %c0_i32_0 : i32, i32
  }
  func.func @transform_2(%arg0: i32, %arg1: i32) -> (i32, i32) {
    %c0_i32 = arith.constant 0 : i32
    %c0_i32_0 = arith.constant 0 : i32
    %c0_i32_1 = arith.constant 0 : i32
    return %c0_i32, %c0_i32_0 : i32, i32
  }
  func.func @transform_3(%arg0: i32, %arg1: i32) -> (i32, i32, i32) {
    %c0_i32 = arith.constant 0 : i32
    %c0_i32_0 = arith.constant 0 : i32
    %c0_i32_1 = arith.constant 0 : i32
    return %arg0, %c0_i32, %c0_i32_0 : i32, i32, i32
  }
  func.func @transform_4(%arg0: i32, %arg1: i32) -> (i32, i32) {
    %c0_i32 = arith.constant 0 : i32
    %c0_i32_0 = arith.constant 0 : i32
    return %arg1, %c0_i32 : i32, i32
  }
  func.func @transform_5(%arg0: i32, %arg1: i32) -> (i32, i32, i32) {
    %c0_i32 = arith.constant 0 : i32
    %c0_i32_0 = arith.constant 0 : i32
    return %arg0, %arg1, %c0_i32 : i32, i32, i32
  }
}

</mosaic_0001>

<bundles_post_ra>
// kernel: module_forward.1
= control target key start
LH: loop header
LB: loop body
LE: loop exit
PB: predicated region body
PF: predicated region fallthrough
CT: control target
= control target key end

     0   :  { %s1577_s18 = smov 0   ;;  %s1579_s19 = smov 0   ;;  %s1848_s0 = inlined_call_operand.vmem [shape: f32[2,88], index: 0, kind: input, shape index: {}]   ;;  %s1849_s1 = inlined_call_operand.vmem [shape: bf16[88,264], index: 1, kind: input, shape index: {}]   ;;  %s1850_s2 = inlined_call_operand.vmem [shape: f32[1,264], index: 2, kind: input, shape index: {}]   ;;  %s1851_s3 = inlined_call_operand.vmem [shape: bf16[2,264,64], index: 3, kind: input, shape index: {}]   ;;  %s1852_s4 = inlined_call_operand.vmem [shape: bf16[384,264], index: 4, kind: input, shape index: {}]   ;;  %s1853_s5 = inlined_call_operand.vmem [shape: f32[2,384,64], index: 5, kind: output, shape index: {}]  }
   0x1   :  { %s1581_s20 = smov 0   ;;  %s1583_s21 = smov 0  }
   0x2   :  { %s1585_s22 = smov 0  }
   0x3 LB: > { %s24_s23 = sadd.s32 1, %s1534_s20  ;;  %s27_s24 = sadd.s32 1, %s1538_s21  ;;  %s1542_s22 = sphi %s1585_s22, %s15_s22   ;;  %s1538_s21 = sphi %s1583_s21, %s1857_s21   ;;  %s1534_s20 = sphi %s1581_s20, %s1856_s20   ;;  %s1530_s19 = sphi %s1579_s19, %s1855_s19   ;;  %s1526_s18 = sphi %s1577_s18, %s1854_s18  }
   0x4   : > { %p25_p0 = scmp.ge.s32.totalorder %s24_s23, 3  ;;  %p1208_p1 = scmp.ge.s32.totalorder %s1542_s22, 1 }
   0x5   : > { %p213_p2 = scmp.lt.s32.totalorder %s1542_s22, 7 }
   0x6   : > { %s1859_s23 = smov (%p25_p0, %s24_s23), 0  ;;  %s1861_s24 = smov (!%p25_p0, %s27_s24), %s1538_s21 }
   0x7   : > { %p214_p3 = pnand %p1208_p1, %p213_p2  ;;  %p29_p4 = scmp.ge.s32.totalorder %s1861_s24, 2 }
   0x8   : > { %s274_s25 = scalar_lea.vmem (!%p214_p3), %s1848_s0, %s1530_s19  ;;  %p251_p5 = scmp.lt.s32.totalorder (!%p214_p3), %s1530_s19, 1 }
   0x9   : > { %s1863_s24 = smov (%p29_p4, %s1861_s24), 0  ;;  %217 = sbr.rel (%p214_p3) target bundleno = 543 (0x21f), region = 40 }
   0xa   : > { %s1210_s7 = sshll.u32 (!%p214_p3), %s1526_s18, 4 }
   0xb   : > { %p257_p6 = scmp.lt.s32.totalorder (!%p214_p3), %s1210_s7, 47 }
   0xe   : > { %v298_v0 = vld [vmem:[%s1849_s1 + $0x78] sm:$0xff]  ;;  %vm409_vm0 = vcmask 1043456   ;;  %v1454_v3 = vld [vmem:[%s1849_s1 + $0x64] ss:$12 sps:$4 sm:$0xff]   ;;  %v1544_v4 = vmov 0   ;;  %vm405_vm1 = vcmask 719872   ;;  %v390_v44 = vlaneseq }
   0xf   : > { %v1230_v1 = vcombine.high %v298_v0, %v298_v0  ;;  %v1229_v2 = vcombine.low %v298_v0, %v298_v0  ;;  %451 = vmatprep.mubr.bf16.mxu1 %v1544_v4  ;;  %v1456_v6 = vld [vmem:[%s1849_s1 + $0x60] ss:$12 sps:$4 sm:$0xff]   ;;  %v1459_v8 = vld [vmem:[%s1849_s1 + $0x48] ss:$12 sps:$4 sm:$0xff]   ;;  %v1462_v10 = vld [vmem:[%s1849_s1 + $0x30] ss:$12 sps:$4 sm:$0xff]  }
  0x10   : > { %v1457_v7 = vld [vmem:[%s1849_s1 + $0x4c] ss:$12 sps:$4 sm:$0xff]   ;;  %v1460_v9 = vld [vmem:[%s1849_s1 + $0x34] ss:$12 sps:$4 sm:$0xff]   ;;  %v1463_v11 = vld [vmem:[%s1849_s1 + $0x1c] ss:$12 sps:$4 sm:$0xff]  }
  0x11   : > { %1232 = vmatprep.subr.msk.bf16.mxu1 %vm409_vm0, %v1230_v1  ;;  %v411_v5 = vsel %vm409_vm0, %v1229_v2, 0  ;;  %v1465_v12 = vld [vmem:[%s1849_s1 + $0x18] ss:$12 sps:$4 sm:$0xff]   ;;  %v275_v13 = vld [vmem:[%s274_s25] sm:$0x1]  ;;  %v1545_v19 = vmov 0.0  }
  0x12   : > { %424 = vmatpush1.bf16.msra.mxu1 %v411_v5  ;;  %v1466_v14 = vld [vmem:[%s1849_s1 + $0x4] ss:$12 sps:$4 sm:$0xff]   ;;  %v276_v15 = vmax.f32 %v275_v13, 0.0  ;;  %v1468_v16 = vld [vmem:[%s1849_s1] ss:$12 sps:$4 sm:$0xff]   ;;  %vm1546_vm2 = vmmov 0  }
  0x13   : > { %425 = vmatprep.subr.bf16.mxu1 %v1454_v3  ;;  %v1469_v17 = vld [vmem:[%s1849_s1 + $0x80] ss:$0 sps:$4 sm:$0xff]   ;;  %v1470_v21 = vld [vmem:[%s1849_s1 + $0x68] ss:$12 sps:$4 sm:$0xff]   ;;  %v1471_v22 = vld [vmem:[%s1849_s1 + $0x50] ss:$12 sps:$4 sm:$0xff]  }
  0x14   : > { %v277_v18 = vpack.c.bf16 %v276_v15, %v276_v15  ;;  %v417_v20 = vsel %vm409_vm0, %v1469_v17, 0  ;;  %v1472_v23 = vld [vmem:[%s1849_s1 + $0x38] ss:$12 sps:$4 sm:$0xff]   ;;  %v1473_v24 = vld [vmem:[%s1849_s1 + $0x20] ss:$12 sps:$4 sm:$0xff]   ;;  %s1865_s19 = smov (!%p251_p5, %s1530_s19), 1 }
  0x15   : > { %v1474_v25 = vld [vmem:[%s1849_s1 + $0x8] ss:$12 sps:$4 sm:$0xff]   ;;  %s1406_s26 = smul.u32 132, %s1865_s19  ;;  %v391_v45 = vshrl.u32 %v390_v44, 7  ;;  %v300_v47 = vld [vmem:[%s1850_s2] sm:$0x7] }
  0x16   : > { %426 = vmatpush1.bf16.msra.mxu1 %v1456_v6  ;;  %s1867_s7 = smov (!%p257_p6, %s1210_s7), 47  ;;  %vm868_vm3 = vcmask 64512   ;;  %s1408_s11 = smul.u32 48, %s1865_s19  ;;  %vm1090_vm4 = vcmask 523264  }
  0x17   : > { %427 = vmatprep.subr.bf16.mxu1 %v1457_v7  ;;  %s1679_s29 = scalar_lea.vmem %s1851_s3, %s1406_s26  ;;  %v1700_v46 = vsub.s32 0, %v391_v45  ;;  %v396_v48 = vsub.s32 1, %v391_v45  ;;  %v400_v59 = vsub.s32 2, %v391_v45  ;;  %s1407_s8 = smul.u32 12, %s1867_s7 }
  0x18   : > { %v1475_v26 = vld [vmem:[%s1679_s29 + $0x78] sm:$0xff]   ;;  %v1477_v28 = vld [vmem:[%s1679_s29 + $0x70] sm:$0xff]   ;;  %v1479_v30 = vld [vmem:[%s1679_s29 + $0x68] sm:$0xff]   ;;  %s269_s12 = sadd.s32 %s1408_s11, %s1867_s7 }
  0x19   : > { %v1476_v27 = vld [vmem:[%s1679_s29 + $0x38] sm:$0xff]   ;;  %1298 = vmatprep.subr.bf16.mxu0 %v1475_v26  ;;  %v1478_v29 = vld [vmem:[%s1679_s29 + $0x30] sm:$0xff]   ;;  %v1480_v31 = vld [vmem:[%s1679_s29 + $0x28] sm:$0xff]   ;;  %v393_v49 = vrot.slane %v300_v47, %v1700_v46  ;;  %v397_v50 = vrot.slane %v300_v47, %v396_v48  ;;  %v401_v0 = vrot.slane %v300_v47, %v400_v59  ;;  %s1713_s18 = scalar_lea.vmem %s1852_s4, %s1407_s8  ;;  %s1213_s13 = sshll.u32 %s269_s12, 3 }
  0x1a   : > { %428 = vmatpush1.bf16.msra.mxu1 %v1459_v8  ;;  %1299 = vmatpush3.bf16.msra.mxu0 %v1476_v27  ;;  %v1481_v32 = vld [vmem:[%s1679_s29 + $0x60] sm:$0xff]   ;;  %v1483_v34 = vld [vmem:[%s1679_s29 + $0x58] sm:$0xff]   ;;  %v1485_v36 = vld [vmem:[%s1679_s29 + $0x50] sm:$0xff]   ;;  %s1799_s16 = scalar_lea.vmem %s1853_s5, %s1213_s13 }
  0x1b   : > { %429 = vmatprep.subr.bf16.mxu1 %v1460_v9  ;;  %1300 = vmatprep.subr.bf16.mxu0 %v1477_v28  ;;  %v1482_v33 = vld [vmem:[%s1679_s29 + $0x20] sm:$0xff]   ;;  %v1484_v35 = vld [vmem:[%s1679_s29 + $0x18] sm:$0xff]   ;;  %v1486_v37 = vld [vmem:[%s1679_s29 + $0x10] sm:$0xff]  }
  0x1c   : > { %v1487_v38 = vld [vmem:[%s1679_s29 + $0x48] sm:$0xff]   ;;  %v1489_v40 = vld [vmem:[%s1679_s29 + $0x40] sm:$0xff]   ;;  %v521_v45 = vld [vmem:[%s1713_s18 + $0x14] sm:$0xf] }
  0x1d   : > { %v1488_v39 = vld [vmem:[%s1679_s29 + $0x8] sm:$0xff]   ;;  %v1490_v41 = vld [vmem:[%s1679_s29] sm:$0xff]  }
  0x1e   : > { %430 = vmatpush1.bf16.msra.mxu1 %v1462_v10  ;;  %1301 = vmatpush3.bf16.msra.mxu0 %v1478_v29  ;;  %v1491_v42 = vld [vmem:[%s1679_s29 + $0x80] ss:$0 sps:$4 sm:$0xff]   ;;  %v520_v17 = vld [vmem:[%s1713_s18 + $0xc] sm:$0xff] }
  0x1f   : > { %431 = vmatprep.subr.bf16.mxu1 %v1463_v11  ;;  %1302 = vmatprep.subr.bf16.mxu0 %v1479_v30  ;;  %v894_v43 = vsel %vm409_vm0, %v1491_v42, 0  ;;  %v526_v29 = vld [vmem:[%s1713_s18 + $0x30] sm:$0xff]  ;;  %v528_v30 = vld [vmem:[%s1713_s18 + $0x3c] sm:$0xff]  ;;  %v525_v48 = vld [vmem:[%s1713_s18 + $0x2c] sm:$0xf] }
  0x20   : > { %v523_v47 = vld [vmem:[%s1713_s18 + $0x20] sm:$0xf] }
  0x22   : > { %432 = vmatpush1.bf16.msra.mxu1 %v1465_v12  ;;  %1303 = vmatpush3.bf16.msra.mxu0 %v1480_v31 }
  0x23   : > { %433 = vmatprep.subr.bf16.mxu1 %v1466_v14  ;;  %1304 = vmatprep.subr.bf16.mxu0 %v1481_v32 }
  0x26   : > { %434 = vmatpush1.bf16.msra.mxu1 %v1468_v16  ;;  %1305 = vmatpush3.bf16.msra.mxu0 %v1482_v33  ;;  %v518_v16 = vld [vmem:[%s1713_s18] sm:$0xff] }
  0x27   : > { %1371 = vmatprep.subr.bf16.mxu1 %v1545_v19  ;;  %1306 = vmatprep.subr.bf16.mxu0 %v1483_v34 }
  0x29   : > { %1233 = vmatmul.mubr.msk.bf16.vlgmr.msra.gmra.mxu1 %vm405_vm1, %v277_v18 }
  0x2a   : > { %1372 = vmatpush3.bf16.msra.mxu1 %v417_v20  ;;  %1383 = vmatprep.mubr.msk.bf16.mxu1 %vm1546_vm2, %v1545_v19 }
  0x2b   : > { %1373 = vmatprep.subr.bf16.mxu1 %v1545_v19  ;;  %1307 = vmatpush3.bf16.msra.mxu0 %v1484_v35 }
  0x2c   : > { %1308 = vmatprep.subr.bf16.mxu0 %v1485_v36  ;;  %v530_v36 = vld [vmem:[%s1713_s18 + $0x48] sm:$0xff] }
  0x2e   : > { %1374 = vmatpush3.bf16.msra.mxu1 %v1470_v21  ;;  %v524_v21 = vld [vmem:[%s1713_s18 + $0x24] sm:$0xff] }
  0x2f   : > { %1375 = vmatprep.subr.bf16.mxu1 %v1545_v19  ;;  %1309 = vmatpush3.bf16.msra.mxu0 %v1486_v37  ;;  %v532_v37 = vld [vmem:[%s1713_s18 + $0x54] sm:$0xff] }
  0x30   : > { %1310 = vmatprep.subr.bf16.mxu0 %v1487_v38 }
  0x32   : > { %1376 = vmatpush3.bf16.msra.mxu1 %v1471_v22 }
  0x33   : > { %1377 = vmatprep.subr.bf16.mxu1 %v1545_v19  ;;  %1311 = vmatpush3.bf16.msra.mxu0 %v1488_v39 }
  0x34   : > { %1312 = vmatprep.subr.bf16.mxu0 %v1489_v40 }
  0x36   : > { %1378 = vmatpush3.bf16.msra.mxu1 %v1472_v23 }
  0x37   : > { %1379 = vmatprep.subr.bf16.mxu1 %v1545_v19  ;;  %1313 = vmatpush3.bf16.msra.mxu0 %v1490_v41 }
  0x3a   : > { %1380 = vmatpush3.bf16.msra.mxu1 %v1473_v24 }
  0x3b   : > { %1381 = vmatprep.subr.bf16.mxu1 %v1545_v19 }
  0x3e   : > { %1382 = vmatpush3.bf16.msra.mxu1 %v1474_v25 }
  0x3f   : > { %1405 = vmatprep.subr.msk.bf16.mxu1 %vm409_vm0, %v1491_v42 }
  0x41   : > { %1384 = vmatmul.mubr.msk.bf16.vlgmr.msra.gmra.mxu1 %vm405_vm1, %v277_v18  ;;  %v522_v18 = vld [vmem:[%s1713_s18 + $0x18] sm:$0xff] }
  0x42   : > { %1388 = vmatpush3.bf16.msra.mxu1 %v894_v43  ;;  %v519_v43 = vld [vmem:[%s1713_s18 + $0x8] sm:$0xf] }
  0xe9   : > { %v453_v51 = vpop.f32.mrf.mxu1 }
  0xea   : > { %v454_v52 = vadd.f32 %v453_v51, %v393_v49  ;;  %v527_v51 = vld [vmem:[%s1713_s18 + $0x38] sm:$0xf] }
  0xeb   : > { %v455_v53 = vpop.f32.mrf.mxu1 }
  0xec   : > { %v1235_v54 = vmul.f32 -1.442695, %v454_v52  ;;  %v456_v55 = vadd.f32 %v455_v53, %v397_v50  ;;  %v529_v52 = vld [vmem:[%s1713_s18 + $0x44] sm:$0xf] }
  0xed   : > { %v457_v56 = vpop.f32.mrf.mxu1  ;;  %v534_v53 = vld [vmem:[%s1713_s18 + $0x60] sm:$0xff] }
  0xee   : > { %1492 = vpow2.f32 %v1235_v54  ;;  %v1236_v57 = vmul.f32 -1.442695, %v456_v55  ;;  %v536_v54 = vld [vmem:[%s1713_s18 + $0x6c] sm:$0xff] }
  0xef   : > { %v458_v58 = vpop.f32.mrf.mxu1 }
  0xf0   : > { %1494 = vpow2.f32 %v1236_v57 }
  0xfb   : > { %v1493_v60 = vpop.eup %1492 }
  0xfc   : > { %v509_v61 = vadd.f32 1.0, %v1493_v60 }
  0xfd   : > { %v1495_v62 = vpop.eup %1494 }
  0xfe   : > { %1496 = vrcp.f32 %v509_v61  ;;  %v510_v63 = vadd.f32 1.0, %v1495_v62 }
 0x100   : > { %1498 = vrcp.f32 %v510_v63 }
 0x101   : > { %v494_v1 = vpop.f32.mrf.mxu1 }
 0x102   : > { %v495_v2 = vadd.f32 %v494_v1, %v401_v0  ;;  %v531_v0 = vld [vmem:[%s1713_s18 + $0x50] sm:$0xf]  ;;  %v533_v1 = vld [vmem:[%s1713_s18 + $0x5c] sm:$0xf] }
 0x103   : > { %v1385_v3 = vpop.f32.mrf.mxu1 }
 0x104   : > { %v1237_v4 = vmul.f32 -1.442695, %v495_v2  ;;  %v535_v3 = vld [vmem:[%s1713_s18 + $0x68] sm:$0xf] }
 0x105   : > { %v497_v5 = vpop.f32.mrf.mxu1 }
 0x106   : > { %1500 = vpow2.f32 %v1237_v4  ;;  %v537_v4 = vld [vmem:[%s1713_s18 + $0x74] sm:$0xf] }
 0x107   : > { %v1386_v6 = vpop.f32.mrf.mxu1 }
 0x10b   : > { %v1497_v7 = vpop.eup %1496 }
 0x10c   : > { %v550_v8 = vpack.c.bf16 %v1497_v7, %v1497_v7 }
 0x10d   : > { %v1499_v9 = vpop.eup %1498 }
 0x10e   : > { %v554_v10 = vpack.i.b16 %v550_v8, %v550_v8  ;;  %v551_v11 = vpack.c.bf16 %v1499_v9, %v1499_v9 }
 0x110   : > { %v561_v12 = vpack.i.b16 %v551_v11, %v551_v11  ;;  %v559_v13 = vrot.slane %v554_v10, %v1700_v46  ;;  %v538_v11 = vld [vmem:[%s1713_s18 + $0x78] sm:$0xff] }
 0x112   : > { %v566_v14 = vrot.slane %v561_v12, %v1700_v46  ;;  %v540_v12 = vld [vmem:[%s1713_s18 + $0x84] sm:$0xff] }
 0x113   : > { %v1501_v15 = vpop.eup %1500 }
 0x114   : > { %v1720_v19 = vcombine.low %v559_v13, %v566_v14  ;;  %v511_v20 = vadd.f32 1.0, %v1501_v15 }
 0x116   : > { %1502 = vrcp.f32 %v511_v20  ;;  %v584_v22 = vmul.bf16 %v1720_v19, %v518_v16  ;;  %v586_v23 = vmul.bf16 %v1720_v19, %v520_v17  ;;  %v588_v24 = vmul.bf16 %v1720_v19, %v522_v18  ;;  %v539_v17 = vld [vmem:[%s1713_s18 + $0x80] sm:$0xf]  ;;  %v541_v18 = vld [vmem:[%s1713_s18 + $0x8c] sm:$0xf] }
 0x117   : > { %v590_v25 = vmul.bf16 %v1720_v19, %v524_v21  ;;  %v592_v31 = vmul.bf16 %v1720_v19, %v526_v29  ;;  %v594_v32 = vmul.bf16 %v1720_v19, %v528_v30  ;;  %v596_v40 = vmul.bf16 %v1720_v19, %v530_v36  ;;  %v543_v21 = vld [vmem:[%s1713_s18 + $0x98] sm:$0xf] }
 0x118   : > { %v1241_v26 = vcombine.high %v584_v22, %v586_v23  ;;  %v1240_v27 = vcombine.low %v584_v22, %v586_v23  ;;  %v598_v41 = vmul.bf16 %v1720_v19, %v532_v37  ;;  %v600_v62 = vmul.bf16 %v1720_v19, %v534_v53  ;;  %v545_v22 = vld [vmem:[%s1713_s18 + $0xa4] sm:$0xf] }
 0x119   : > { %v1244_v28 = vcombine.high %v588_v24, %v590_v25  ;;  %v1243_v33 = vcombine.low %v588_v24, %v590_v25  ;;  %v1247_v34 = vcombine.high %v592_v31, %v594_v32  ;;  %v1246_v44 = vcombine.low %v592_v31, %v594_v32 }
 0x11a   : > { %928 = vmatprep.mubr.bf16.mxu0 %v1241_v26  ;;  %v1250_v50 = vcombine.high %v596_v40, %v598_v41  ;;  %v602_v63 = vmul.bf16 %v1720_v19, %v536_v54  ;;  %v1249_v5 = vcombine.low %v596_v40, %v598_v41  ;;  %v604_v14 = vmul.bf16 %v1720_v19, %v538_v11  ;;  %v542_v26 = vld [vmem:[%s1713_s18 + $0x90] sm:$0xff]  ;;  %v546_v40 = vld [vmem:[%s1713_s18 + $0xa8] sm:$0xff] }
 0x11b   : > { %929 = vmatmul.mubr.bf16.vlgmr.msra.gmra.mxu0 %v1240_v27  ;;  %v606_v15 = vmul.bf16 %v1720_v19, %v540_v12  ;;  %v544_v27 = vld [vmem:[%s1713_s18 + $0x9c] sm:$0xff]  ;;  %v608_v30 = vmul.bf16 %v1720_v19, %v542_v26  ;;  %v548_v41 = vld [vmem:[%s1713_s18 + $0xb4] sm:$0xff] }
 0x11c   : > { %936 = vmatprep.mubr.bf16.mxu0 %v1244_v28  ;;  %v1253_v8 = vcombine.high %v600_v62, %v602_v63  ;;  %v1252_v20 = vcombine.low %v600_v62, %v602_v63  ;;  %v610_v31 = vmul.bf16 %v1720_v19, %v544_v27 }
 0x11d   : > { %v1256_v23 = vcombine.high %v604_v14, %v606_v15  ;;  %v1255_v36 = vcombine.low %v604_v14, %v606_v15 }
 0x11e   : > { %v1259_v37 = vcombine.high %v608_v30, %v610_v31 }
 0x123   : > { %v1503_v35 = vpop.eup %1502  ;;  %937 = vmatmul.mubr.bf16.gmra.mxu0 %v1243_v33 }
 0x124   : > { %v552_v38 = vpack.c.bf16 %v1503_v35, %v1503_v35  ;;  %944 = vmatprep.mubr.bf16.mxu0 %v1247_v34  ;;  %v547_v34 = vld [vmem:[%s1713_s18 + $0xb0] sm:$0xf]  ;;  %v549_v35 = vld [vmem:[%s1713_s18 + $0xbc] sm:$0xf] }
 0x126   : > { %v568_v39 = vpack.i.b16 %v552_v38, %v552_v38 }
 0x128   : > { %v573_v42 = vrot.slane %v568_v39, %v1700_v46 }
 0x12a   : > { %v1740_v49 = vcombine.low %v573_v42, %v573_v42  ;;  %v612_v42 = vmul.bf16 %v1720_v19, %v546_v40 }
 0x12b   : > { %945 = vmatmul.mubr.bf16.gmra.mxu0 %v1246_v44 }
 0x12c   : > { %952 = vmatprep.mubr.bf16.mxu0 %v1250_v50  ;;  %v585_v46 = vmul.bf16 %v1740_v49, %v519_v43  ;;  %v587_v55 = vmul.bf16 %v1740_v49, %v521_v45  ;;  %v589_v56 = vmul.bf16 %v1740_v49, %v523_v47  ;;  %v591_v57 = vmul.bf16 %v1740_v49, %v525_v48 }
 0x12d   : > { %v593_v58 = vmul.bf16 %v1740_v49, %v527_v51  ;;  %v595_v59 = vmul.bf16 %v1740_v49, %v529_v52  ;;  %v597_v6 = vmul.bf16 %v1740_v49, %v531_v0  ;;  %v599_v7 = vmul.bf16 %v1740_v49, %v533_v1 }
 0x12e   : > { %v1242_v60 = vcombine.low %v585_v46, %v587_v55  ;;  %v1245_v61 = vcombine.low %v589_v56, %v591_v57  ;;  %v601_v9 = vmul.bf16 %v1740_v49, %v535_v3  ;;  %v603_v10 = vmul.bf16 %v1740_v49, %v537_v4 }
 0x12f   : > { %v1248_v2 = vcombine.low %v593_v58, %v595_v59  ;;  %v1251_v13 = vcombine.low %v597_v6, %v599_v7  ;;  %v605_v24 = vmul.bf16 %v1740_v49, %v539_v17  ;;  %v607_v25 = vmul.bf16 %v1740_v49, %v541_v18 }
 0x130   : > { %1389 = vmatprep.mubr.msk.bf16.mxu1 %vm868_vm3, %v1242_v60  ;;  %v1254_v16 = vcombine.low %v601_v9, %v603_v10  ;;  %v609_v28 = vmul.bf16 %v1740_v49, %v543_v21  ;;  %v611_v29 = vmul.bf16 %v1740_v49, %v545_v22  ;;  %v613_v38 = vmul.bf16 %v1740_v49, %v547_v34 }
 0x131   : > { %1390 = vmatmul.mubr.msk.bf16.vlgmr.msra.gmra.mxu1 %vm868_vm3, %v1245_v61  ;;  %v1257_v32 = vcombine.low %v605_v24, %v607_v25  ;;  %v615_v39 = vmul.bf16 %v1740_v49, %v549_v35  ;;  %v614_v43 = vmul.bf16 %v1720_v19, %v548_v41  ;;  %v1258_v45 = vcombine.low %v608_v30, %v610_v31 }
 0x132   : > { %1393 = vmatprep.mubr.msk.bf16.mxu1 %vm868_vm3, %v1248_v2  ;;  %v1260_v33 = vcombine.low %v609_v28, %v611_v29 }
 0x133   : > { %953 = vmatmul.mubr.bf16.gmra.mxu0 %v1249_v5  ;;  %v1263_v44 = vcombine.low %v613_v38, %v615_v39  ;;  %v1262_v47 = vcombine.high %v612_v42, %v614_v43  ;;  %v1261_v48 = vcombine.low %v612_v42, %v614_v43 }
 0x134   : > { %960 = vmatprep.mubr.bf16.mxu0 %v1253_v8 }
 0x139   : > { %1394 = vmatmul.mubr.msk.bf16.gmra.mxu1 %vm868_vm3, %v1251_v13 }
 0x13a   : > { %1397 = vmatprep.mubr.msk.bf16.mxu1 %vm868_vm3, %v1254_v16 }
 0x13b   : > { %961 = vmatmul.mubr.bf16.gmra.mxu0 %v1252_v20 }
 0x13c   : > { %968 = vmatprep.mubr.bf16.mxu0 %v1256_v23 }
 0x141   : > { %1398 = vmatmul.mubr.msk.bf16.gmra.mxu1 %vm868_vm3, %v1257_v32 }
 0x142   : > { %1401 = vmatprep.mubr.msk.bf16.mxu1 %vm868_vm3, %v1260_v33 }
 0x143   : > { %969 = vmatmul.mubr.bf16.gmra.mxu0 %v1255_v36 }
 0x144   : > { %976 = vmatprep.mubr.bf16.mxu0 %v1259_v37 }
 0x149   : > { %1402 = vmatmul.mubr.msk.bf16.gmra.mxu1 %vm868_vm3, %v1263_v44 }
 0x14b   : > { %977 = vmatmul.mubr.bf16.gmra.mxu0 %v1258_v45 }
 0x14c   : > { %984 = vmatprep.mubr.bf16.mxu0 %v1262_v47 }
 0x153   : > { %985 = vmatmul.mubr.bf16.gmra.mxu0 %v1261_v48 }
 0x1db   : > { %v1314_v50 = vpop.f32.mrf.mxu0 }
 0x1dd   : > { %v1315_v49 = vpop.f32.mrf.mxu0 }
 0x1de   : > { %v1316_v61 = vadd.f32 %v1315_v49, %v1314_v50 }
 0x1df   : > { %v1317_v51 = vpop.f32.mrf.mxu0 }
 0x1e1   : > { %v1318_v52 = vpop.f32.mrf.mxu0 }
 0x1e2   : > { %v1319_v5 = vadd.f32 %v1318_v52, %v1317_v51 }
 0x1e3   : > { %v1320_v53 = vpop.f32.mrf.mxu0 }
 0x1e5   : > { %v1321_v54 = vpop.f32.mrf.mxu0 }
 0x1e6   : > { %v1322_v58 = vadd.f32 %v1321_v54, %v1320_v53 }
 0x1e7   : > { %v1323_v46 = vpop.f32.mrf.mxu0 }
 0x1e9   : > { %v1324_v19 = vpop.f32.mrf.mxu0 }
 0x1ea   : > { %v1325_v1 = vadd.f32 %v1324_v19, %v1323_v46 }
 0x1eb   : > { %v1326_v55 = vpop.f32.mrf.mxu0 }
 0x1ed   : > { %v1327_v56 = vpop.f32.mrf.mxu0 }
 0x1ee   : > { %v1328_v13 = vadd.f32 %v1327_v56, %v1326_v55 }
 0x1ef   : > { %v1329_v57 = vpop.f32.mrf.mxu0 }
 0x1f1   : > { %v1330_v59 = vpop.f32.mrf.mxu0  ;;  %v1391_v60 = vpop.f32.mrf.mxu1 }
 0x1f2   : > { %v1036_v62 = vadd.f32 %v1391_v60, %v1322_v58  ;;  %v1331_v22 = vadd.f32 %v1330_v59, %v1329_v57 }
 0x1f3   : > { %v1332_v63 = vpop.f32.mrf.mxu0  ;;  %v1027_v0 = vpop.f32.mrf.mxu1 }
 0x1f4   : > { %1093 = vst.msk [vmem:[%s1799_s16 + $0x10] sm:$0xff] %vm1090_vm4, %v1036_v62  ;;  %v1028_v2 = vadd.f32 %v1316_v61, %v1027_v0 }
 0x1f5   : > { %v1333_v3 = vpop.f32.mrf.mxu0  ;;  %v1392_v4 = vpop.f32.mrf.mxu1 }
 0x1f6   : > { %1091 = vst.msk [vmem:[%s1799_s16] sm:$0xff] %vm1090_vm4, %v1028_v2  ;;  %v1039_v6 = vadd.f32 %v1392_v4, %v1325_v1  ;;  %v1334_v9 = vadd.f32 %v1333_v3, %v1332_v63 }
 0x1f7   : > { %v1335_v7 = vpop.f32.mrf.mxu0  ;;  %v1030_v8 = vpop.f32.mrf.mxu1 }
 0x1f8   : > { %1094 = vst.msk [vmem:[%s1799_s16 + $0x18] sm:$0xff] %vm1090_vm4, %v1039_v6  ;;  %v1031_v10 = vadd.f32 %v1319_v5, %v1030_v8 }
 0x1f9   : > { %v1336_v11 = vpop.f32.mrf.mxu0  ;;  %v1395_v12 = vpop.f32.mrf.mxu1 }
 0x1fa   : > { %1092 = vst.msk [vmem:[%s1799_s16 + $0x8] sm:$0xff] %vm1090_vm4, %v1031_v10  ;;  %v1052_v14 = vadd.f32 %v1395_v12, %v1334_v9  ;;  %v1337_v17 = vadd.f32 %v1336_v11, %v1335_v7 }
 0x1fb   : > { %v1338_v15 = vpop.f32.mrf.mxu0  ;;  %v1043_v16 = vpop.f32.mrf.mxu1 }
 0x1fc   : > { %1097 = vst.msk [vmem:[%s1799_s16 + $0x30] sm:$0xff] %vm1090_vm4, %v1052_v14  ;;  %v1044_v18 = vadd.f32 %v1328_v13, %v1043_v16 }
 0x1fd   : > { %v1339_v20 = vpop.f32.mrf.mxu0  ;;  %v1396_v21 = vpop.f32.mrf.mxu1 }
 0x1fe   : > { %1095 = vst.msk [vmem:[%s1799_s16 + $0x20] sm:$0xff] %vm1090_vm4, %v1044_v18  ;;  %v1055_v23 = vadd.f32 %v1396_v21, %v1337_v17  ;;  %v1340_v29 = vadd.f32 %v1339_v20, %v1338_v15 }
 0x1ff   : > { %v1341_v24 = vpop.f32.mrf.mxu0  ;;  %v1046_v25 = vpop.f32.mrf.mxu1 }
 0x200   : > { %1098 = vst.msk [vmem:[%s1799_s16 + $0x38] sm:$0xff] %vm1090_vm4, %v1055_v23  ;;  %v1047_v26 = vadd.f32 %v1331_v22, %v1046_v25 }
 0x201   : > { %v1342_v27 = vpop.f32.mrf.mxu0  ;;  %v1399_v28 = vpop.f32.mrf.mxu1 }
 0x202   : > { %1096 = vst.msk [vmem:[%s1799_s16 + $0x28] sm:$0xff] %vm1090_vm4, %v1047_v26  ;;  %v1343_v35 = vadd.f32 %v1342_v27, %v1341_v24 }
 0x203   : > { %v1344_v30 = vpop.f32.mrf.mxu0  ;;  %v1059_v31 = vpop.f32.mrf.mxu1 }
 0x204   : > { %v1060_v32 = vadd.f32 %v1340_v29, %v1059_v31 }
 0x205   : > { %v1345_v33 = vpop.f32.mrf.mxu0  ;;  %v1400_v34 = vpop.f32.mrf.mxu1 }
 0x206   : > { %1099 = vst.msk [vmem:[%s1799_s16 + $0x40] sm:$0xff] %vm1090_vm4, %v1060_v32  ;;  %v1346_v36 = vadd.f32 %v1345_v33, %v1344_v30 }
 0x207   : > { %v1347_v37 = vpop.f32.mrf.mxu0  ;;  %v1062_v38 = vpop.f32.mrf.mxu1 }
 0x208   : > { %v1068_v39 = vadd.f32 %v1399_v28, %v1346_v36  ;;  %v1063_v40 = vadd.f32 %v1343_v35, %v1062_v38 }
 0x209   : > { %v1348_v41 = vpop.f32.mrf.mxu0  ;;  %v1403_v42 = vpop.f32.mrf.mxu1 }
 0x20a   : > { %1101 = vst.msk [vmem:[%s1799_s16 + $0x50] sm:$0xff] %vm1090_vm4, %v1068_v39  ;;  %1100 = vst.msk [vmem:[%s1799_s16 + $0x48] sm:$0xff] %vm1090_vm4, %v1063_v40  ;;  %v1349_v43 = vadd.f32 %v1348_v41, %v1347_v37 }
 0x20b   : > { %v1350_v44 = vpop.f32.mrf.mxu0  ;;  %v1075_v45 = vpop.f32.mrf.mxu1 }
 0x20c   : > { %v1071_v47 = vadd.f32 %v1400_v34, %v1349_v43 }
 0x20d   : > { %v1351_v48 = vpop.f32.mrf.mxu0  ;;  %v1404_v49 = vpop.f32.mrf.mxu1 }
 0x20e   : > { %1102 = vst.msk [vmem:[%s1799_s16 + $0x58] sm:$0xff] %vm1090_vm4, %v1071_v47  ;;  %v1352_v50 = vadd.f32 %v1351_v48, %v1350_v44 }
 0x20f   : > { %v1353_v51 = vpop.f32.mrf.mxu0  ;;  %v1078_v46 = vpop.f32.mrf.mxu1 }
 0x210   : > { %v1076_v52 = vadd.f32 %v1352_v50, %v1075_v45 }
 0x211   : > { %v1354_v53 = vpop.f32.mrf.mxu0 }
 0x212   : > { %1103 = vst.msk [vmem:[%s1799_s16 + $0x60] sm:$0xff] %vm1090_vm4, %v1076_v52  ;;  %v1355_v54 = vadd.f32 %v1354_v53, %v1353_v51 }
 0x213   : > { %v1356_v19 = vpop.f32.mrf.mxu0 }
 0x214   : > { %v1079_v55 = vadd.f32 %v1355_v54, %v1078_v46 }
 0x215   : > { %v1357_v56 = vpop.f32.mrf.mxu0 }
 0x216   : > { %1104 = vst.msk [vmem:[%s1799_s16 + $0x68] sm:$0xff] %vm1090_vm4, %v1079_v55  ;;  %v1358_v57 = vadd.f32 %v1357_v56, %v1356_v19 }
 0x217   : > { %v1359_v58 = vpop.f32.mrf.mxu0 }
 0x218   : > { %v1084_v59 = vadd.f32 %v1403_v42, %v1358_v57 }
 0x219   : > { %v1360_v60 = vpop.f32.mrf.mxu0 }
 0x21a   : > { %1105 = vst.msk [vmem:[%s1799_s16 + $0x70] sm:$0xff] %vm1090_vm4, %v1084_v59  ;;  %v1361_v61 = vadd.f32 %v1360_v60, %v1359_v58 }
 0x21c   : > { %v1087_v62 = vadd.f32 %v1404_v49, %v1361_v61 }
 0x21e   : > { %1106 = vst.msk [vmem:[%s1799_s16 + $0x78] sm:$0xff] %vm1090_vm4, %v1087_v62 }
 0x21f PF: > { %s15_s22 = sadd.s32 1, %s1542_s22   ;;  %s1854_s18 = smov %s1534_s20 }
 0x220   : > { %p12_p7 = scmp.ge.s32.totalorder %s15_s22, 8   ;;  %s1855_s19 = smov %s1538_s21 }
 0x221   : > { %s1856_s20 = smov %s1859_s23  ;;  %s1857_s21 = smov %s1863_s24 }
 0x222   :  { %14 = sbr.rel (!%p12_p7) target bundleno = 3 (0x3), region = 74 }

</bundles_post_ra>
